<compile_context>
chip_gen: v7x
topology: tpu7x:2x2x1
jax: 0.10.0
libtpu: 0.0.40
codegen_flags: <defaults>
</compile_context>

<pallas_src>
import jax
import jax.numpy as jnp
from jax.experimental import pallas as pl
from jax.experimental.pallas import tpu as pltpu

_F32 = jnp.float32
_F32_BYTES = 4


def _vmem_block_bytes(bt, s, h):
    """Estimated VMEM footprint (bytes) of one grid step at batch-block bt."""
    b = _F32_BYTES
    keys_blk = bt * s * h * b
    q_blk = bt * h * b
    w_blk = h * h * b                      # one (H,H) weight matrix
    vec_blk = h * b                        # folded bias / va weight row
    ctx_blk = bt * h * b
    attn_blk = bt * s * b
    # BlockSpec double-buffers every pipelined operand.
    pipelined = 2 * (keys_blk + q_blk + 2 * w_blk + 2 * vec_blk + ctx_blk + attn_blk)
    # ~4 live (bt,S,H) f32 intermediates: ua_k, e, attn*k product, relayout slack.
    live = 4 * bt * s * h * b
    return pipelined + live


def _vmem_budget_bytes():
    """~75% of this chip's per-core VMEM (v5e/v6e: 128 MiB, v7x: 64 MiB)."""
    cap = 64 << 20                         # assume the smallest (v7x) if unknown
    try:
        info = pltpu.get_tpu_info()
        cap = int(getattr(info, "vmem_capacity_bytes", cap)) or cap
    except Exception:
        pass
    return (cap // 4) * 3


def _choose_block_b(batch_pad, seq, hidden, vmem_budget):
    """Batches per grid step.

    Candidates are 8-aligned divisors of the padded batch (keeps the 2-D
    query/context/weights blocks (8,128)-legal and sublane-dense).  Among the
    candidates that fit the VMEM budget we target ~512 key rows per step
    (amortizes the ~0.35us/step overhead, keeps the keys DMA near the HBM
    roofline) while preferring >= 2 grid steps so ("parallel",) can use both
    v7x TensorCores.
    """
    cands = [d for d in range(8, batch_pad + 1, 8) if batch_pad % d == 0]
    fitting = [d for d in cands if _vmem_block_bytes(d, seq, hidden) <= vmem_budget]
    if not fitting:
        fitting = [cands[0]]               # smallest legal block; limit gives headroom
    multi = [d for d in fitting if batch_pad // d >= 2]
    pool = multi if multi else fitting
    target_rows = 512
    good = [d for d in pool if d * seq >= target_rows]
    return min(good) if good else max(pool)


def _make_kernel(bt, s, h):
    def kernel(q_ref, k_ref, wa_w_ref, bias_ref, ua_w_ref, va_w_ref,
               ctx_ref, w_ref):
        q = q_ref[...]                                    # (bt, h)
        k = k_ref[...]                                    # (bt, s, h)

        # wa(query) + (wa_b + ua_b): biases were folded on the host so the big
        # (bt,S,H) tensor below never needs a separate bias broadcast-add.
        wa_q = jnp.dot(q, wa_w_ref[...],
                       preferred_element_type=jnp.float32) + bias_ref[...]

        # ua(keys): one large (bt*S, H) @ (H, H) MXU matmul (bulk of FLOPs).
        # Collapsing (bt,S) into the sublane axis is tile-exact when S % 8 == 0;
        # otherwise it costs a relayout copy but stays correct.
        ua_k = jnp.dot(k.reshape(bt * s, h), ua_w_ref[...],
                       preferred_element_type=jnp.float32).reshape(bt, s, h)

        e = jnp.tanh(wa_q[:, None, :] + ua_k)             # (bt, s, h), EUP tanh

        # va projection (out_features == 1): VPU multiply + XLU lane reduction
        # instead of an M=1 MXU matmul.  The va bias is dropped -- a scalar
        # added uniformly to scores cancels in the softmax.
        va_w = va_w_ref[...].reshape(1, 1, h)
        scores = jnp.sum(e * va_w, axis=-1)                # (bt, s)

        # Numerically stable softmax over s.
        m = jnp.max(scores, axis=-1, keepdims=True)
        ex = jnp.exp(scores - m)
        denom = jnp.sum(ex, axis=-1, keepdims=True)
        inv = pl.reciprocal(denom, approx=True)            # EUP vrcp
        inv = inv * (2.0 - denom * inv)                    # Newton step -> f32 accuracy
        attn = ex * inv                                    # (bt, s)

        # context = weights @ keys as VPU multiply + sublane (XLU) reduction;
        # overlaps with the MXU work of the next pipelined step.
        ctx = jnp.sum(attn[:, :, None] * k, axis=1)        # (bt, h), f32

        ctx_ref[...] = ctx.astype(ctx_ref.dtype)
        w_ref[...] = attn.astype(w_ref.dtype)

    return kernel


def bahdanau_attention(query, keys, params, *, block_b=None):
    """query: (B,1,H), keys: (B,S,H). Returns (context (B,1,H), weights (B,1,S))."""
    B, q_len, H = query.shape
    assert q_len == 1, "BahdanauAttention expects a single query step"
    S = keys.shape[1]

    # nn.Linear: y = x @ W.T + b  -> pre-transpose W so the kernel does x @ Wt.
    wa_w_t = jnp.asarray(params["wa_w"], _F32).T            # (H, H)
    ua_w_t = jnp.asarray(params["ua_w"], _F32).T            # (H, H)
    # Fold wa_b + ua_b into a single bias added to wa(query) only; drop va_b
    # (softmax-invariant, a no-op for both returned outputs).
    bias = (jnp.asarray(params["wa_b"], _F32)
            + jnp.asarray(params["ua_b"], _F32)).reshape(1, H)
    va_w = jnp.asarray(params["va_w"], _F32).reshape(1, H)

    q2d = query.reshape(B, H).astype(_F32)
    keys_in = jnp.asarray(keys, _F32)

    # Zero-pad the batch to a multiple of 8 so all 2-D batch blocks are legal
    # and sublane-dense regardless of B (padded rows produce finite garbage
    # that is sliced off below).
    B_pad = ((B + 7) // 8) * 8
    if B_pad != B:
        pad = B_pad - B
        q2d = jnp.pad(q2d, ((0, pad), (0, 0)))
        keys_in = jnp.pad(keys_in, ((0, pad), (0, 0), (0, 0)))

    vmem_budget = _vmem_budget_bytes()
    if block_b is None:
        block_b = _choose_block_b(B_pad, S, H, vmem_budget)
    assert B_pad % block_b == 0 and (block_b % 8 == 0 or block_b == B_pad)
    grid = (B_pad // block_b,)

    kernel = _make_kernel(block_b, S, H)

    # Advisory cost estimate (dominant term: ua matmul).
    flops = int(2 * B_pad * S * H * H + 2 * B_pad * H * H + 6 * B_pad * S * H)
    transcendentals = int(B_pad * S * H + 2 * B_pad * S)       # tanh + exp + rcp
    bytes_accessed = int((B_pad * S * H + B_pad * H            # keys, query
                          + 2 * H * H + 2 * H                  # weights, bias, va
                          + B_pad * H + B_pad * S) * _F32_BYTES)  # outputs

    ctx2d, w2d = pl.pallas_call(
        kernel,
        out_shape=(
            jax.ShapeDtypeStruct((B_pad, H), _F32),
            jax.ShapeDtypeStruct((B_pad, S), _F32),
        ),
        grid_spec=pltpu.PrefetchScalarGridSpec(
            num_scalar_prefetch=0,
            grid=grid,
            in_specs=[
                pl.BlockSpec((block_b, H), lambda b: (b, 0)),        # query
                pl.BlockSpec((block_b, S, H), lambda b: (b, 0, 0)),  # keys
                pl.BlockSpec((H, H), lambda b: (0, 0)),              # wa_w_t
                pl.BlockSpec((1, H), lambda b: (0, 0)),              # folded bias
                pl.BlockSpec((H, H), lambda b: (0, 0)),              # ua_w_t
                pl.BlockSpec((1, H), lambda b: (0, 0)),              # va_w
            ],
            out_specs=[
                pl.BlockSpec((block_b, H), lambda b: (b, 0)),        # context
                pl.BlockSpec((block_b, S), lambda b: (b, 0)),        # weights
            ],
        ),
        compiler_params=pltpu.CompilerParams(
            dimension_semantics=("parallel",),
            vmem_limit_bytes=int(vmem_budget),
        ),
        cost_estimate=pl.CostEstimate(
            flops=flops,
            transcendentals=transcendentals,
            bytes_accessed=bytes_accessed,
        ),
    )(q2d, keys_in, wa_w_t, bias, ua_w_t, va_w)

    return ctx2d[:B].reshape(B, 1, H), w2d[:B].reshape(B, 1, S)


def _reference(query, keys, params):
    """Same math as the PyTorch module, evaluated at full f32 precision."""
    hi = jax.lax.Precision.HIGHEST
    wa = jnp.einsum("bqh,oh->bqo", query, params["wa_w"], precision=hi) + params["wa_b"]
    ua = jnp.einsum("bsh,oh->bso", keys, params["ua_w"], precision=hi) + params["ua_b"]
    e = jnp.tanh(wa + ua)                                                 # (B,S,H)
    scores = (jnp.einsum("bsh,oh->bso", e, params["va_w"], precision=hi)[..., 0]
              + params["va_b"][0])                                        # (B,S)
    weights = jax.nn.softmax(scores[:, None, :], axis=-1)                 # (B,1,S)
    context = jnp.einsum("bqs,bsh->bqh", weights, keys, precision=hi)     # (B,1,H)
    return context, weights


if __name__ == "__main__":
    B, S, H = 2, 8, 32
    key = jax.random.PRNGKey(0)
    k1, k2, k3, k4, k5, k6, k7, k8 = jax.random.split(key, 8)

    # Deterministic parameter init (shapes follow nn.Linear conventions).
    bound = 1.0 / (H ** 0.5)
    params = {
        "wa_w": jax.random.uniform(k1, (H, H), jnp.float32, -bound, bound),
        "wa_b": jax.random.uniform(k2, (H,), jnp.float32, -bound, bound),
        "ua_w": jax.random.uniform(k3, (H, H), jnp.float32, -bound, bound),
        "ua_b": jax.random.uniform(k4, (H,), jnp.float32, -bound, bound),
        "va_w": jax.random.uniform(k5, (1, H), jnp.float32, -bound, bound),
        "va_b": jax.random.uniform(k6, (1,), jnp.float32, -bound, bound),
    }

    query = jax.random.normal(k7, (B, 1, H), jnp.float32)
    keys = jax.random.normal(k8, (B, S, H), jnp.float32)

    ctx, weights = bahdanau_attention(query, keys, params)
    ctx = jax.block_until_ready(ctx)
    weights = jax.block_until_ready(weights)

    ref_ctx, ref_w = _reference(query, keys, params)
    assert ctx.shape == (B, 1, H) and weights.shape == (B, 1, S)
    assert jnp.allclose(ctx, ref_ctx, atol=1e-5, rtol=1e-5)
    assert jnp.allclose(weights, ref_w, atol=1e-5, rtol=1e-5)

    print("KERNEL_OK")
</pallas_src>

<mosaic_0001>
module attributes {stable_mosaic.version = 11 : i64} {
  func.func @kernel(%arg0: i32, %arg1: memref<8x32xf32, #tpu.memory_space<vmem>>, %arg2: memref<8x8x32xf32, #tpu.memory_space<vmem>>, %arg3: memref<32x32xf32, #tpu.memory_space<vmem>>, %arg4: memref<1x32xf32, #tpu.memory_space<vmem>>, %arg5: memref<32x32xf32, #tpu.memory_space<vmem>>, %arg6: memref<1x32xf32, #tpu.memory_space<vmem>>, %arg7: memref<8x32xf32, #tpu.memory_space<vmem>>, %arg8: memref<8x8xf32, #tpu.memory_space<vmem>>) attributes {dimension_semantics = [#tpu.dimension_semantics<parallel>], iteration_bounds = array<i64: 1>, scalar_prefetch = 0 : i64, scratch_operands = 0 : i64, tpu.core_type = #tpu.core_type<tc>, window_params = [{transform_indices = @transform_0, window_bounds = array<i64: 8, 32>}, {transform_indices = @transform_1, window_bounds = array<i64: 8, 8, 32>}, {pipeline_mode = #tpu.pipeline_mode<synchronous>, transform_indices = @transform_2, window_bounds = array<i64: 32, 32>}, {pipeline_mode = #tpu.pipeline_mode<synchronous>, transform_indices = @transform_3, window_bounds = array<i64: 1, 32>}, {pipeline_mode = #tpu.pipeline_mode<synchronous>, transform_indices = @transform_4, window_bounds = array<i64: 32, 32>}, {pipeline_mode = #tpu.pipeline_mode<synchronous>, transform_indices = @transform_5, window_bounds = array<i64: 1, 32>}, {transform_indices = @transform_6, window_bounds = array<i64: 8, 32>}, {transform_indices = @transform_7, window_bounds = array<i64: 8, 8>}]} {
    %c0 = arith.constant 0 : index
    %c0_0 = arith.constant 0 : index
    %0 = vector.load %arg1[%c0, %c0_0] : memref<8x32xf32, #tpu.memory_space<vmem>>, vector<8x32xf32>
    %c0_1 = arith.constant 0 : index
    %c0_2 = arith.constant 0 : index
    %c0_3 = arith.constant 0 : index
    %1 = vector.load %arg2[%c0_1, %c0_2, %c0_3] : memref<8x8x32xf32, #tpu.memory_space<vmem>>, vector<8x8x32xf32>
    %c0_4 = arith.constant 0 : index
    %c0_5 = arith.constant 0 : index
    %2 = vector.load %arg3[%c0_4, %c0_5] : memref<32x32xf32, #tpu.memory_space<vmem>>, vector<32x32xf32>
    %cst = arith.constant dense<0.000000e+00> : vector<8x32xf32>
    %3 = tpu.matmul %0, %2, %cst {dimension_numbers = #tpu.dot_dimension_numbers<[1], [0], [0], [1], [0, 0, 1, 1], [], []>} : vector<8x32xf32>, vector<32x32xf32>, vector<8x32xf32> -> vector<8x32xf32>
    %c0_6 = arith.constant 0 : index
    %c0_7 = arith.constant 0 : index
    %4 = vector.load %arg4[%c0_6, %c0_7] : memref<1x32xf32, #tpu.memory_space<vmem>>, vector<1x32xf32>
    %5 = vector.broadcast %4 : vector<1x32xf32> to vector<8x32xf32>
    %6 = arith.addf %3, %5 : vector<8x32xf32>
    %7 = vector.shape_cast %1 : vector<8x8x32xf32> to vector<64x32xf32>
    %c0_8 = arith.constant 0 : index
    %c0_9 = arith.constant 0 : index
    %8 = vector.load %arg5[%c0_8, %c0_9] : memref<32x32xf32, #tpu.memory_space<vmem>>, vector<32x32xf32>
    %cst_10 = arith.constant dense<0.000000e+00> : vector<64x32xf32>
    %9 = tpu.matmul %7, %8, %cst_10 {dimension_numbers = #tpu.dot_dimension_numbers<[1], [0], [0], [1], [0, 0, 1, 1], [], []>} : vector<64x32xf32>, vector<32x32xf32>, vector<64x32xf32> -> vector<64x32xf32>
    %10 = vector.shape_cast %9 : vector<64x32xf32> to vector<8x8x32xf32>
    %11 = vector.shape_cast %6 : vector<8x32xf32> to vector<8x1x32xf32>
    %12 = vector.broadcast %11 : vector<8x1x32xf32> to vector<8x8x32xf32>
    %13 = arith.addf %12, %10 : vector<8x8x32xf32>
    %14 = math.tanh %13 : vector<8x8x32xf32>
    %c0_11 = arith.constant 0 : index
    %c0_12 = arith.constant 0 : index
    %15 = vector.load %arg6[%c0_11, %c0_12] : memref<1x32xf32, #tpu.memory_space<vmem>>, vector<1x32xf32>
    %16 = vector.shape_cast %15 : vector<1x32xf32> to vector<1x1x32xf32>
    %17 = vector.broadcast %16 : vector<1x1x32xf32> to vector<8x8x32xf32>
    %18 = arith.mulf %14, %17 : vector<8x8x32xf32>
    %cst_13 = arith.constant dense<0.000000e+00> : vector<8x8xf32>
    %19 = vector.multi_reduction <add>, %18, %cst_13 [2] : vector<8x8x32xf32> to vector<8x8xf32>
    %cst_14 = arith.constant dense<0xFF800000> : vector<8xf32>
    %20 = vector.multi_reduction <maximumf>, %19, %cst_14 [1] : vector<8x8xf32> to vector<8xf32>
    %21 = vector.shape_cast %20 : vector<8xf32> to vector<8x1xf32>
    %22 = vector.broadcast %21 : vector<8x1xf32> to vector<8x8xf32>
    %23 = arith.subf %19, %22 : vector<8x8xf32>
    %24 = math.exp %23 : vector<8x8xf32>
    %cst_15 = arith.constant dense<0.000000e+00> : vector<8xf32>
    %25 = vector.multi_reduction <add>, %24, %cst_15 [1] : vector<8x8xf32> to vector<8xf32>
    %26 = vector.shape_cast %25 : vector<8xf32> to vector<8x1xf32>
    %27 = tpu.reciprocal %26 {approx = true} : vector<8x1xf32> -> vector<8x1xf32>
    %28 = arith.mulf %26, %27 : vector<8x1xf32>
    %cst_16 = arith.constant 2.000000e+00 : f32
    %29 = vector.broadcast %cst_16 : f32 to vector<8x1xf32>
    %30 = arith.subf %29, %28 : vector<8x1xf32>
    %31 = arith.mulf %27, %30 : vector<8x1xf32>
    %32 = vector.broadcast %31 : vector<8x1xf32> to vector<8x8xf32>
    %33 = arith.mulf %24, %32 : vector<8x8xf32>
    %34 = vector.shape_cast %33 : vector<8x8xf32> to vector<8x8x1xf32>
    %35 = vector.broadcast %34 : vector<8x8x1xf32> to vector<8x8x32xf32>
    %36 = arith.mulf %35, %1 : vector<8x8x32xf32>
    %cst_17 = arith.constant dense<0.000000e+00> : vector<8x32xf32>
    %37 = vector.multi_reduction <add>, %36, %cst_17 [1] : vector<8x8x32xf32> to vector<8x32xf32>
    %c0_18 = arith.constant 0 : index
    %c0_19 = arith.constant 0 : index
    %38 = vector.load %arg7[%c0_18, %c0_19] : memref<8x32xf32, #tpu.memory_space<vmem>>, vector<8x32xf32>
    tpu.vector_store %arg7[%c0_18, %c0_19], %37 {strides = array<i32>} : memref<8x32xf32, #tpu.memory_space<vmem>>, vector<8x32xf32>,
    %c0_20 = arith.constant 0 : index
    %c0_21 = arith.constant 0 : index
    %39 = vector.load %arg8[%c0_20, %c0_21] : memref<8x8xf32, #tpu.memory_space<vmem>>, vector<8x8xf32>
    tpu.vector_store %arg8[%c0_20, %c0_21], %33 {strides = array<i32>} : memref<8x8xf32, #tpu.memory_space<vmem>>, vector<8x8xf32>,
    return
  }
  func.func @transform_0(%arg0: i32) -> (i32, i32) {
    %c0_i32 = arith.constant 0 : i32
    %c0_i32_0 = arith.constant 0 : i32
    return %arg0, %c0_i32 : i32, i32
  }
  func.func @transform_1(%arg0: i32) -> (i32, i32, i32) {
    %c0_i32 = arith.constant 0 : i32
    %c0_i32_0 = arith.constant 0 : i32
    %c0_i32_1 = arith.constant 0 : i32
    return %arg0, %c0_i32, %c0_i32_0 : i32, i32, i32
  }
  func.func @transform_2(%arg0: i32) -> (i32, i32) {
    %c0_i32 = arith.constant 0 : i32
    %c0_i32_0 = arith.constant 0 : i32
    %c0_i32_1 = arith.constant 0 : i32
    return %c0_i32, %c0_i32_0 : i32, i32
  }
  func.func @transform_3(%arg0: i32) -> (i32, i32) {
    %c0_i32 = arith.constant 0 : i32
    %c0_i32_0 = arith.constant 0 : i32
    %c0_i32_1 = arith.constant 0 : i32
    return %c0_i32, %c0_i32_0 : i32, i32
  }
  func.func @transform_4(%arg0: i32) -> (i32, i32) {
    %c0_i32 = arith.constant 0 : i32
    %c0_i32_0 = arith.constant 0 : i32
    %c0_i32_1 = arith.constant 0 : i32
    return %c0_i32, %c0_i32_0 : i32, i32
  }
  func.func @transform_5(%arg0: i32) -> (i32, i32) {
    %c0_i32 = arith.constant 0 : i32
    %c0_i32_0 = arith.constant 0 : i32
    %c0_i32_1 = arith.constant 0 : i32
    return %c0_i32, %c0_i32_0 : i32, i32
  }
  func.func @transform_6(%arg0: i32) -> (i32, i32) {
    %c0_i32 = arith.constant 0 : i32
    %c0_i32_0 = arith.constant 0 : i32
    return %arg0, %c0_i32 : i32, i32
  }
  func.func @transform_7(%arg0: i32) -> (i32, i32) {
    %c0_i32 = arith.constant 0 : i32
    %c0_i32_0 = arith.constant 0 : i32
    return %arg0, %c0_i32 : i32, i32
  }
}

</mosaic_0001>

<bundles_post_ra>
// kernel: tpu_custom_call.1
= control target key start
LH: loop header
LB: loop body
LE: loop exit
PB: predicated region body
PF: predicated region fallthrough
CT: control target
= control target key end

     0   :  { %13 = vsyncpa [#allocation3], 0  ;;  %s1476_s0 = inlined_call_operand.hbm [shape: f32[8,32], index: 0, kind: input, shape index: {}]   ;;  %s1477_s1 = inlined_call_operand.hbm [shape: f32[8,8,32], index: 1, kind: input, shape index: {}]   ;;  %s1478_s2 = inlined_call_operand.hbm [shape: f32[32,32], index: 2, kind: input, shape index: {}]   ;;  %s1479_s3 = inlined_call_operand.vmem [shape: f32[1,32], index: 3, kind: input, shape index: {}]   ;;  %s1480_s4 = inlined_call_operand.hbm [shape: f32[32,32], index: 4, kind: input, shape index: {}]   ;;  %s1481_s5 = inlined_call_operand.vmem [shape: f32[1,32], index: 5, kind: input, shape index: {}]   ;;  %s1482_s6 = inlined_call_operand.hbm [shape: f32[8,32], index: 6, kind: output, shape index: {0}]   ;;  %s1483_s7 = inlined_call_operand.hbm [shape: f32[8,8], index: 7, kind: output, shape index: {1}]  }
   0x1   :  { %14 = vsyncpa [#allocation6], 0 }
   0x2   :  { %15 = vsyncpa [#allocation9], 0 }
   0x3   :  { %16 = vsyncpa [#allocation4], 0 }
   0x4   :  { %17 = vsyncpa [#allocation12], 0  ;;  %s1167_s24 = smov [#allocation5]   ;;  %s1025_s28 = scalar_lea.hbm %s1477_s1, 1024 }
   0x5   :  { %s33_s25 = sshll.u32 %s1167_s24, 4  ;;  %p1026_p0 = scmp.ne.s32.totalorder %s1477_s1, %s1025_s28  ;;  %s34_s25 = int_to_ptr.vmem [resolvable:$true] %s33_s25 }
   0x6   :  { %p1029_p1 = scmp.lt.u32.totalorder %s1025_s28, %s1477_s1 }
   0x8   :  { %p1031_p2 = pnand %p1029_p1, %p1026_p0 }
   0xa   :  { %1034 = shalt.err (!%p1031_p2)
}
   0xb   :  { %s1035_s10 = scalar_lea.vmem %s34_s25, 1024  ;;  %p1040_p4 = scmp.lt.s32.totalorder %s34_s25, %s34_s25 }
   0xc   :  { %p1036_p3 = scmp.ne.s32.totalorder %s34_s25, %s1035_s10  ;;  %p1041_p5 = scmp.lt.s32.totalorder %s1035_s10, %s1035_s10 }
   0xe   :  { %p1042_p6 = por %p1041_p5, %p1040_p4 }
  0x10   :  { %p1043_p7 = pnand %p1042_p6, %p1036_p3 }
  0x12   :  { %1046 = shalt.err (!%p1043_p7)
}
  0x13   :  { %s1168_s11 = smov 128   ;;  %s1169_s12 = smov 8  }
  0x14   :  { %39 = dma.hbm_to_vmem [thread:$0]  %s1477_s1, 1024, %s34_s25, [#allocation6], %s1168_s11, %s1168_s11, %s1169_s12  }
  0x15   :  { %s1170_s15 = smov [#allocation2]   ;;  %s1171_s17 = smov [#allocation7]  }
  0x16   :  { %s24_s16 = sshll.u32 %s1170_s15, 4  ;;  %s45_s18 = sshll.u32 %s1171_s17, 4  ;;  %s25_s16 = int_to_ptr.vmem [resolvable:$true] %s24_s16  ;;  %s46_s18 = int_to_ptr.vmem [resolvable:$true] %s45_s18 }
  0x17   :  { %s1047_s21 = scalar_lea.hbm %s1476_s0, 128 }
  0x18   :  { %p1048_p8 = scmp.ne.s32.totalorder %s1476_s0, %s1047_s21  ;;  %p1051_p9 = scmp.lt.u32.totalorder %s1047_s21, %s1476_s0 }
  0x1a   :  { %p1053_p10 = pnand %p1051_p9, %p1048_p8 }
  0x1c   :  { %1056 = shalt.err (!%p1053_p10)
}
  0x1d   :  { %s1057_s1 = scalar_lea.vmem %s25_s16, 128  ;;  %p1062_p12 = scmp.lt.s32.totalorder %s25_s16, %s25_s16 }
  0x1e   :  { %p1058_p11 = scmp.ne.s32.totalorder %s25_s16, %s1057_s1  ;;  %p1063_p13 = scmp.lt.s32.totalorder %s1057_s1, %s1057_s1 }
  0x20   :  { %p1064_p0 = por %p1063_p13, %p1062_p12 }
  0x22   :  { %p1065_p1 = pnand %p1064_p0, %p1058_p11 }
  0x24   :  { %1068 = shalt.err (!%p1065_p1)
}
  0x25   :  { %27 = dma.hbm_to_vmem [thread:$0]  %s1476_s0, 128, %s25_s16, [#allocation3]  }
  0x26   :  { %s1069_s30 = scalar_lea.hbm %s1478_s2, 512 }
  0x27   :  { %p1070_p2 = scmp.ne.s32.totalorder %s1478_s2, %s1069_s30  ;;  %p1073_p3 = scmp.lt.u32.totalorder %s1069_s30, %s1478_s2 }
  0x29   :  { %p1075_p4 = pnand %p1073_p3, %p1070_p2 }
  0x2b   :  { %1078 = shalt.err (!%p1075_p4)
}
  0x2c   :  { %s1079_s14 = scalar_lea.vmem %s46_s18, 512  ;;  %p1084_p6 = scmp.lt.s32.totalorder %s46_s18, %s46_s18 }
  0x2d   :  { %p1080_p5 = scmp.ne.s32.totalorder %s46_s18, %s1079_s14  ;;  %p1085_p7 = scmp.lt.s32.totalorder %s1079_s14, %s1079_s14 }
  0x2f   :  { %p1086_p8 = por %p1085_p7, %p1084_p6 }
  0x31   :  { %p1087_p9 = pnand %p1086_p8, %p1080_p5 }
  0x33   :  { %1090 = shalt.err (!%p1087_p9)
}
  0x34   :  { %51 = dma.hbm_to_vmem [thread:$0]  %s1478_s2, 512, %s46_s18, [#allocation6], %s1168_s11, %s1168_s11, %s1169_s12  }
  0x35   :  { %s1172_s16 = smov [#allocation8]   ;;  %s1091_s21 = scalar_lea.hbm %s1480_s4, 512 }
  0x36   :  { %s59_s17 = sshll.u32 %s1172_s16, 4  ;;  %p1092_p10 = scmp.ne.s32.totalorder %s1480_s4, %s1091_s21  ;;  %s60_s17 = int_to_ptr.vmem [resolvable:$true] %s59_s17 }
  0x37   :  { %p1095_p11 = scmp.lt.u32.totalorder %s1091_s21, %s1480_s4 }
  0x39   :  { %p1097_p12 = pnand %p1095_p11, %p1092_p10 }
  0x3b   :  { %1100 = shalt.err (!%p1097_p12)
}
  0x3c   :  { %s1101_s1 = scalar_lea.vmem %s60_s17, 512  ;;  %p1106_p0 = scmp.lt.s32.totalorder %s60_s17, %s60_s17 }
  0x3d   :  { %p1102_p13 = scmp.ne.s32.totalorder %s60_s17, %s1101_s1  ;;  %p1107_p1 = scmp.lt.s32.totalorder %s1101_s1, %s1101_s1 }
  0x3f   :  { %p1108_p2 = por %p1107_p1, %p1106_p0 }
  0x41   :  { %p1109_p3 = pnand %p1108_p2, %p1102_p13 }
  0x43   :  { %1112 = shalt.err (!%p1109_p3)
}
  0x44   :  { %65 = dma.hbm_to_vmem [thread:$0]  %s1480_s4, 512, %s60_s17, [#allocation9], %s1168_s11, %s1168_s11, %s1169_s12  }
  0x45   :  { %1157 = dma.done.wait [#allocation3], 128  }
  0x46   :  { %1158 = vsyncadd [#allocation3], 4294967168 }
  0x47   :  { %1159 = dma.done.wait [#allocation6], 1536  }
  0x48   :  { %1160 = vsyncadd [#allocation6], 4294965760 }
  0x49   :  { %1161 = dma.done.wait [#allocation9], 512  }
  0x4a   :  { %1162 = vsyncadd [#allocation9], 4294966784  ;;  %v1173_v0 = vmov 0.0|0.0   ;;  %vm1174_vm0 = vmmov 0   ;;  %v1175_v1 = vmov 0.0   ;;  %v89_v2 = vld [vmem:[#allocation7] sm:$0xff]  ;;  %v312_v25 = vlaneseq }
  0x4b   :  { %958 = vmatprep.subr.bf16.mxu0 %v1173_v0  ;;  %935 = vmatprep.mubr.msk.f32.mxu0 %vm1174_vm0, %v1175_v1  ;;  %v90_v3 = vld [vmem:[#allocation7 + $0x8] sm:$0xff]  ;;  %v174_v4 = vld [vmem:[#allocation8] sm:$0xff]  ;;  %v91_v7 = vld [vmem:[#allocation7 + $0x10] sm:$0xff]  ;;  %vm100_vm1 = vcmask 261120   ;;  %v1176_v23 = vmov 1966171168  }
  0x4c   :  { %v959_v5 = vpack.c.bf16 %v90_v3, %v89_v2  ;;  %v175_v6 = vld [vmem:[#allocation8 + $0x8] sm:$0xff]  ;;  %v92_v8 = vld [vmem:[#allocation7 + $0x18] sm:$0xff]  ;;  %v176_v10 = vld [vmem:[#allocation8 + $0x10] sm:$0xff]  ;;  %v310_v24 = vunpack.c.l.s4 %v1176_v23  ;;  %v1311_v27 = vshrl.u32 %v312_v25, 7  ;;  %vm494_vm2 = vcmask 1041409  }
  0x4d   :  { %v964_v9 = vpack.c.bf16 %v175_v6, %v174_v4  ;;  %v177_v11 = vld [vmem:[#allocation8 + $0x18] sm:$0xff]  ;;  %v962_v12 = vpack.c.bf16 %v92_v8, %v91_v7  ;;  %v1277_v14 = vld [vmem:[#allocation5 + $0x10] sm:$0xff]  ;;  %v1281_v16 = vld [vmem:[#allocation5] sm:$0xff]  ;;  %vm496_vm3 = vcmask 1042434   ;;  %vm498_vm4 = vcmask 1043459  }
  0x4e   :  { %960 = vmatpush3.bf16.msra.mxu0 %v959_v5  ;;  %v968_v13 = vpack.c.bf16 %v177_v11, %v176_v10  ;;  %949 = vmatprep.mubr.msk.f32.mxu1 %vm100_vm1, %v1277_v14  ;;  %v80_v15 = vld [vmem:[#allocation2] sm:$0xff]  ;;  %v1286_v18 = vld [vmem:[#allocation5 + $0x20] sm:$0xff]  ;;  %v1294_v19 = vld [vmem:[#allocation5 + $0x28] sm:$0xff]  ;;  %v311_v26 = vunpack.c.0.s8 %v310_v24  ;;  %v1318_v36 = vsub.s32 0, %v1311_v27  ;;  %vm500_vm5 = vcmask 1044484  }
  0x4f   :  { %972 = vmatprep.subr.bf16.mxu1 %v964_v9  ;;  %961 = vmatprep.subr.bf16.mxu0 %v1173_v0  ;;  %v1283_v17 = vld [vmem:[#allocation5 + $0x18] sm:$0xff]  ;;  %v1296_v20 = vld [vmem:[#allocation5 + $0x30] sm:$0xff]  ;;  %v1298_v21 = vld [vmem:[#allocation5 + $0x8] sm:$0xff]  ;;  %vm502_vm6 = vcmask 1045509   ;;  %vm504_vm7 = vcmask 1046534   ;;  %vm506_vm8 = vcmask 1047559  }
  0x50   :  { %974 = vmatpush3.bf16.msra.mxu1 %v964_v9  ;;  %v1304_v22 = vld [vmem:[#allocation5 + $0x38] sm:$0xff]  ;;  %v314_v29 = vsub.s32 %v311_v26, %v1311_v27  ;;  %vm509_vm9 = vcmask 64512  }
  0x51   :  { %973 = vmatprep.subr.bf16.mxu1 %v968_v13  ;;  %v899_v28 = vld [vmem:[%s1479_s3] ss:$0 sm:$0xff] }
  0x52   :  { %963 = vmatpush3.bf16.msra.mxu0 %v962_v12  ;;  %v909_v7 = vld [vmem:[%s1481_s5] ss:$0 sm:$0xff]  ;;  %s1178_s5 = smov [#allocation11]  }
  0x53   :  { %965 = vmatprep.subr.bf16.mxu0 %v964_v9  ;;  %s884_s25 = sshll.u32 %s1178_s5, 4  ;;  %s885_s25 = int_to_ptr.vmem [resolvable:$true] %s884_s25 }
  0x54   :  { %975 = vmatpush3.bf16.msra.mxu1 %v968_v13  ;;  %s1113_s27 = scalar_lea.vmem %s885_s25, 128  ;;  %p1118_p5 = scmp.lt.s32.totalorder %s885_s25, %s885_s25 }
  0x55   :  { %936 = vmatmul.mubr.msk.f32.vlgmr.msra.gmra.mrb[0].mxu0 %vm100_vm1, %v80_v15  ;;  %p1114_p4 = scmp.ne.s32.totalorder %s885_s25, %s1113_s27  ;;  %p1119_p6 = scmp.lt.s32.totalorder %s1113_s27, %s1113_s27 }
  0x56   :  { %967 = vmatpush3.bf16.msra.mxu0 %v964_v9  ;;  %946 = vmatprep.mubr.msk.f32.mxu0 %vm100_vm1, %v1281_v16 }
  0x57   :  { %950 = vmatmul.mubr.msk.f32.vlgmr.msra.gmra.mrb[0].mxu1 %vm100_vm1, %v1283_v17  ;;  %969 = vmatprep.subr.bf16.mxu0 %v968_v13  ;;  %p1120_p7 = por %p1119_p6, %p1118_p5 }
  0x58   :  { %952 = vmatprep.mubr.msk.f32.mxu1 %vm100_vm1, %v1286_v18 }
  0x59   :  { %p1121_p8 = pnand %p1120_p7, %p1114_p4 }
  0x5a   :  { %971 = vmatpush3.bf16.msra.mxu0 %v968_v13 }
  0x5b   :  { %953 = vmatmul.mubr.msk.f32.gmra.mrb[2].mxu1 %vm100_vm1, %v1294_v19 }
  0x5c   :  { %955 = vmatprep.mubr.msk.f32.mxu1 %vm100_vm1, %v1296_v20 }
  0x5d   :  { %947 = vmatmul.mubr.msk.f32.vlgmr.msra.gmra.mrb[2].mxu0 %vm100_vm1, %v1298_v21 }
  0x5f   :  { %956 = vmatmul.mubr.msk.f32.gmra.mrb[4].mxu1 %vm100_vm1, %v1304_v22 }
 0x128   :  { %v170_v30 = vpop.f32.mrb[0].mxu0 }
 0x129   :  { %v171_v31 = vadd.f32 %v899_v28, %v170_v30  ;;  %v937_v32 = vpop.f32.mrb[1].mxu0 }
 0x12a   :  { %v951_v33 = vpop.f32.mrb[0].mxu1 }
 0x12b   :  { %v308_v34 = vcombine.high %v171_v31, %v171_v31  ;;  %v315_v35 = vrot.slane %v171_v31, %v314_v29  ;;  %v278_v37 = vpop.f32.mrb[1].mxu1 }
 0x12d   :  { %v322_v38 = vrot.slane %v308_v34, %v314_v29  ;;  %v323_v39 = vcombine.high %v315_v35, %v315_v35  ;;  %v331_v40 = vrot.slane %v315_v35, %v314_v29 }
 0x12e   :  { %v954_v41 = vpop.f32.mrb[2].mxu1 }
 0x12f   :  { %v345_v42 = vrot.slane %v323_v39, %v314_v29  ;;  %v353_v43 = vcombine.high %v331_v40, %v331_v40  ;;  %v360_v44 = vrot.slane %v331_v40, %v1318_v36  ;;  %v324_v45 = vcombine.high %v322_v38, %v322_v38  ;;  %v288_v46 = vpop.f32.mrb[3].mxu1 }
 0x130   :  { %v948_v47 = vpop.f32.mrb[2].mxu0  ;;  %v338_v48 = vrot.slane %v322_v38, %v314_v29 }
 0x131   :  { %v355_v49 = vcombine.high %v345_v42, %v345_v42  ;;  %v364_v50 = vrot.slane %v345_v42, %v1318_v36  ;;  %v368_v51 = vrot.slane %v353_v43, %v1318_v36  ;;  %v268_v52 = vpop.f32.mrb[3].mxu0  ;;  %v352_v53 = vrot.slane %v324_v45, %v314_v29 }
 0x132   :  { %v397_v54 = vadd.f32 %v360_v44, %v268_v52  ;;  %v376_v55 = vrot.slane %v338_v48, %v1318_v36  ;;  %v957_v56 = vpop.f32.mrb[4].mxu1  ;;  %v354_v57 = vcombine.high %v338_v48, %v338_v48  ;;  %v461_v43 = vand.u32 127, %v312_v25 }
 0x133   :  { %v372_v58 = vrot.slane %v355_v49, %v1318_v36  ;;  %v398_v59 = vadd.f32 %v948_v47, %v364_v50  ;;  %v399_v60 = vadd.f32 %v368_v51, %v278_v37  ;;  %v380_v61 = vrot.slane %v352_v53, %v1318_v36  ;;  %v298_v62 = vpop.f32.mrb[5].mxu1 }
 0x134   :  { %991 = vtanh.f32 %v397_v54  ;;  %v401_v63 = vadd.f32 %v376_v55, %v288_v46  ;;  %v356_v0 = vcombine.high %v352_v53, %v352_v53  ;;  %v384_v1 = vrot.slane %v354_v57, %v1318_v36 }
 0x135   :  { %v400_v2 = vadd.f32 %v951_v33, %v372_v58  ;;  %993 = vtanh.f32 %v398_v59  ;;  %v402_v3 = vadd.f32 %v954_v41, %v380_v61  ;;  %v1341_v45 = vsub.s32 %v461_v43, %v1311_v27 }
 0x136   :  { %995 = vtanh.f32 %v399_v60  ;;  %v388_v4 = vrot.slane %v356_v0, %v1318_v36  ;;  %v403_v5 = vadd.f32 %v384_v1, %v298_v62 }
 0x137   :  { %997 = vtanh.f32 %v400_v2 }
 0x138   :  { %v404_v6 = vadd.f32 %v957_v56, %v388_v4  ;;  %999 = vtanh.f32 %v401_v63  ;;  %v1177_v4 = vmov 0  }
 0x139   :  { %1001 = vtanh.f32 %v402_v3  ;;  %990 = vset.pattern.permute.xlu0 %v1177_v4  ;;  %989 = vset.pattern.permute.xlu1 %v1177_v4 }
 0x13a   :  { %1003 = vtanh.f32 %v403_v5  ;;  %v520_v5 = vsub.s32 1, %v1311_v27 }
 0x13b   :  { %1005 = vtanh.f32 %v404_v6  ;;  %v524_v6 = vsub.s32 2, %v1311_v27 }
 0x13e   :  { %v992_v8 = vpop.eup %991 }
 0x13f   :  { %v994_v9 = vpop.eup %993  ;;  %v420_v10 = vmul.f32 %v992_v8, %v909_v7 }
 0x140   :  { %v996_v11 = vpop.eup %995  ;;  %v421_v23 = vmul.f32 %v994_v9, %v909_v7 }
 0x141   :  { %v998_v12 = vpop.eup %997  ;;  %v428_v13 = vsel %vm100_vm1, %v420_v10, 0.0  ;;  %v422_v15 = vmul.f32 %v996_v11, %v909_v7 }
 0x142   :  { %429 = vadd.xlane.f32.xlu0 %v428_v13  ;;  %v1000_v24 = vpop.eup %999  ;;  %v423_v28 = vmul.f32 %v998_v12, %v909_v7  ;;  %v431_v30 = vsel %vm100_vm1, %v421_v23, 0.0  ;;  %v532_v12 = vsub.s32 4, %v1311_v27 }
 0x143   :  { %v434_v26 = vsel %vm100_vm1, %v422_v15, 0.0  ;;  %v1002_v29 = vpop.eup %1001  ;;  %v424_v31 = vmul.f32 %v1000_v24, %v909_v7 }
 0x144   :  { %435 = vadd.xlane.f32.xlu1 %v434_v26  ;;  %v1004_v32 = vpop.eup %1003  ;;  %v437_v33 = vsel %vm100_vm1, %v423_v28, 0.0  ;;  %v425_v34 = vmul.f32 %v1002_v29, %v909_v7  ;;  %v536_v29 = vsub.s32 5, %v1311_v27 }
 0x145   :  { %v1006_v35 = vpop.eup %1005  ;;  %v440_v37 = vsel %vm100_vm1, %v424_v31, 0.0  ;;  %v426_v38 = vmul.f32 %v1004_v32, %v909_v7 }
 0x146   :  { %432 = vadd.xlane.f32.xlu0 %v431_v30  ;;  %v443_v39 = vsel %vm100_vm1, %v425_v34, 0.0  ;;  %v427_v40 = vmul.f32 %v1006_v35, %v909_v7  ;;  %v528_v7 = vsub.s32 3, %v1311_v27 }
 0x147   :  { %v446_v41 = vsel %vm100_vm1, %v426_v38, 0.0  ;;  %v544_v38 = vsub.s32 7, %v1311_v27 }
 0x148   :  { %438 = vadd.xlane.f32.xlu1 %v437_v33  ;;  %v449_v42 = vsel %vm100_vm1, %v427_v40, 0.0  ;;  %v540_v33 = vsub.s32 6, %v1311_v27 }
 0x14a   :  { %441 = vadd.xlane.f32.xlu0 %v440_v37 }
 0x14c   :  { %444 = vadd.xlane.f32.xlu1 %v443_v39 }
 0x14e   :  { %447 = vadd.xlane.f32.xlu0 %v446_v41 }
 0x150   :  { %450 = vadd.xlane.f32.xlu1 %v449_v42 }
 0x1cf   :  { %v430_v44 = vpop.xlane.xlu0 %429 }
 0x1d0   :  { %v465_v48 = vrot.slane %v430_v44, %v1341_v45 }
 0x1d1   :  { %v436_v46 = vpop.xlane.xlu1 %435 }
 0x1d2   :  { %v473_v50 = vrot.slane %v436_v46, %v1341_v45 }
 0x1d3   :  { %v433_v47 = vpop.xlane.xlu0 %432 }
 0x1d4   :  { %v469_v49 = vrot.slane %v433_v47, %v1341_v45 }
 0x1d5   :  { %v439_v51 = vpop.xlane.xlu1 %438 }
 0x1d6   :  { %v495_v52 = vsel %vm494_vm2, %v469_v49, %v465_v48  ;;  %v477_v25 = vrot.slane %v439_v51, %v1341_v45 }
 0x1d7   :  { %v497_v53 = vsel %vm496_vm3, %v473_v50, %v495_v52  ;;  %v442_v54 = vpop.xlane.xlu0 %441 }
 0x1d8   :  { %v499_v55 = vsel %vm498_vm4, %v477_v25, %v497_v53  ;;  %v481_v56 = vrot.slane %v442_v54, %v1341_v45 }
 0x1d9   :  { %v445_v57 = vpop.xlane.xlu1 %444 }
 0x1da   :  { %v501_v58 = vsel %vm500_vm5, %v481_v56, %v499_v55  ;;  %v485_v59 = vrot.slane %v445_v57, %v1341_v45 }
 0x1db   :  { %v448_v60 = vpop.xlane.xlu0 %447 }
 0x1dc   :  { %v489_v61 = vrot.slane %v448_v60, %v1341_v45  ;;  %v503_v63 = vsel %vm502_vm6, %v485_v59, %v501_v58 }
 0x1dd   :  { %v451_v62 = vpop.xlane.xlu1 %450 }
 0x1de   :  { %v493_v0 = vrot.slane %v451_v62, %v1341_v45  ;;  %v505_v1 = vsel %vm504_vm7, %v489_v61, %v503_v63 }
 0x1e0   :  { %v507_v2 = vsel %vm506_vm8, %v493_v0, %v505_v1 }
 0x1e1   :  { %v510_v3 = vsel %vm509_vm9, %v507_v2, -inf }
 0x1e2   :  { %511 = vmax.xlane.f32.xlu0 %v510_v3 }
 0x26f   :  { %v512_v8 = vpop.xlane.xlu0 %511 }
 0x270   :  { %v517_v9 = vrot.slane %v512_v8, %v1318_v36  ;;  %v521_v10 = vrot.slane %v512_v8, %v520_v5  ;;  %v525_v11 = vrot.slane %v512_v8, %v524_v6  ;;  %v529_v13 = vrot.slane %v512_v8, %v528_v7 }
 0x271   :  { %v533_v30 = vrot.slane %v512_v8, %v532_v12  ;;  %v537_v34 = vrot.slane %v512_v8, %v536_v29  ;;  %v541_v39 = vrot.slane %v512_v8, %v540_v33 }
 0x272   :  { %v554_v15 = vsub.f32 %v430_v44, %v517_v9  ;;  %v555_v23 = vsub.f32 %v433_v47, %v521_v10  ;;  %v556_v24 = vsub.f32 %v436_v46, %v525_v11  ;;  %v557_v31 = vsub.f32 %v439_v51, %v529_v13 }
 0x273   :  { %v558_v35 = vsub.f32 %v442_v54, %v533_v30  ;;  %v559_v40 = vsub.f32 %v445_v57, %v537_v34  ;;  %v545_v44 = vrot.slane %v512_v8, %v544_v38  ;;  %v560_v46 = vsub.f32 %v448_v60, %v541_v39 }
 0x274   :  { %v562_v26 = vmul.f32 1.442695, %v554_v15  ;;  %v564_v28 = vmul.f32 1.442695, %v555_v23  ;;  %v566_v32 = vmul.f32 1.442695, %v556_v24 }
 0x275   :  { %v568_v37 = vmul.f32 1.442695, %v557_v31  ;;  %v570_v41 = vmul.f32 1.442695, %v558_v35  ;;  %v572_v47 = vmul.f32 1.442695, %v559_v40  ;;  %v561_v49 = vsub.f32 %v451_v62, %v545_v44 }
 0x276   :  { %1007 = vpow2.f32 %v562_v26  ;;  %v574_v50 = vmul.f32 1.442695, %v560_v46 }
 0x277   :  { %1009 = vpow2.f32 %v564_v28  ;;  %v576_v52 = vmul.f32 1.442695, %v561_v49 }
 0x278   :  { %1011 = vpow2.f32 %v566_v32 }
 0x279   :  { %1013 = vpow2.f32 %v568_v37 }
 0x27a   :  { %1015 = vpow2.f32 %v570_v41 }
 0x27b   :  { %1017 = vpow2.f32 %v572_v47 }
 0x27c   :  { %1019 = vpow2.f32 %v574_v50 }
 0x27d   :  { %1021 = vpow2.f32 %v576_v52 }
 0x280   :  { %v1008_v42 = vpop.eup %1007 }
 0x281   :  { %v1010_v43 = vpop.eup %1009  ;;  %587 = vperm.xlu1 %989, %v1008_v42  }
 0x282   :  { %590 = vperm.xlu0 %990, %v1010_v43   ;;  %v1012_v48 = vpop.eup %1011 }
 0x283   :  { %v1014_v51 = vpop.eup %1013 }
 0x284   :  { %v1016_v25 = vpop.eup %1015 }
 0x285   :  { %593 = vperm.xlu1 %989, %v1012_v48   ;;  %v1018_v53 = vpop.eup %1017 }
 0x286   :  { %v1020_v54 = vpop.eup %1019 }
 0x287   :  { %v1022_v55 = vpop.eup %1021 }
 0x289   :  { %596 = vperm.xlu1 %989, %v1014_v51  }
 0x28d   :  { %599 = vperm.xlu1 %989, %v1016_v25  }
 0x291   :  { %602 = vperm.xlu1 %989, %v1018_v53  }
 0x295   :  { %605 = vperm.xlu1 %989, %v1020_v54  }
 0x299   :  { %608 = vperm.xlu1 %989, %v1022_v55  }
 0x300   :  { %v588_v56 = vpop.permute.xlu1 %587 }
 0x301   :  { %v591_v60 = vpop.permute.xlu0 %590  ;;  %v613_v63 = vrot.slane %v588_v56, %v1341_v45 }
 0x302   :  { %v617_v62 = vrot.slane %v591_v60, %v1341_v45 }
 0x304   :  { %v594_v57 = vpop.permute.xlu1 %593  ;;  %v642_v4 = vsel %vm494_vm2, %v617_v62, %v613_v63 }
 0x305   :  { %v621_v0 = vrot.slane %v594_v57, %v1341_v45 }
 0x307   :  { %v643_v9 = vsel %vm496_vm3, %v621_v0, %v642_v4 }
 0x308   :  { %v597_v58 = vpop.permute.xlu1 %596 }
 0x309   :  { %v625_v1 = vrot.slane %v597_v58, %v1341_v45 }
 0x30b   :  { %v644_v11 = vsel %vm498_vm4, %v625_v1, %v643_v9 }
 0x30c   :  { %v600_v59 = vpop.permute.xlu1 %599 }
 0x30d   :  { %v629_v2 = vrot.slane %v600_v59, %v1341_v45 }
 0x30f   :  { %v645_v13 = vsel %vm500_vm5, %v629_v2, %v644_v11 }
 0x310   :  { %v603_v61 = vpop.permute.xlu1 %602 }
 0x311   :  { %v633_v8 = vrot.slane %v603_v61, %v1341_v45 }
 0x313   :  { %v646_v23 = vsel %vm502_vm6, %v633_v8, %v645_v13 }
 0x314   :  { %v606_v3 = vpop.permute.xlu1 %605 }
 0x315   :  { %v637_v10 = vrot.slane %v606_v3, %v1341_v45 }
 0x317   :  { %v647_v26 = vsel %vm504_vm7, %v637_v10, %v646_v23 }
 0x318   :  { %v609_v15 = vpop.permute.xlu1 %608 }
 0x319   :  { %v641_v24 = vrot.slane %v609_v15, %v1341_v45 }
 0x31b   :  { %v648_v28 = vsel %vm506_vm8, %v641_v24, %v647_v26 }
 0x31c   :  { %v650_v30 = vsel %vm509_vm9, %v648_v28, 0.0 }
 0x31d   :  { %651 = vadd.xlane.f32.xlu1 %v650_v30 }
 0x3aa   :  { %v652_v31 = vpop.xlane.xlu1 %651 }
 0x3ab   :  { %1023 = vrcp.f32 %v652_v31 }
 0x3b5   :  { %v1024_v32 = vpop.eup %1023 }
 0x3b6   :  { %v654_v34 = vmul.f32 %v1024_v32, %v652_v31 }
 0x3b8   :  { %v655_v35 = vsub.f32 2.0, %v654_v34 }
 0x3ba   :  { %v656_v37 = vmul.f32 %v1024_v32, %v655_v35 }
 0x3bc   :  { %v661_v39 = vrot.slane %v656_v37, %v1318_v36  ;;  %v665_v41 = vrot.slane %v656_v37, %v520_v5  ;;  %v669_v46 = vrot.slane %v656_v37, %v524_v6  ;;  %v673_v49 = vrot.slane %v656_v37, %v528_v7 }
 0x3bd   :  { %v677_v52 = vrot.slane %v656_v37, %v532_v12  ;;  %v681_v5 = vrot.slane %v656_v37, %v536_v29  ;;  %v685_v6 = vrot.slane %v656_v37, %v540_v33  ;;  %v689_v7 = vrot.slane %v656_v37, %v544_v38 }
 0x3be   :  { %v698_v40 = vmul.f32 %v1008_v42, %v661_v39  ;;  %v699_v44 = vmul.f32 %v1010_v43, %v665_v41  ;;  %v700_v47 = vmul.f32 %v1012_v48, %v669_v46  ;;  %v701_v50 = vmul.f32 %v1014_v51, %v673_v49 }
 0x3bf   :  { %v702_v36 = vmul.f32 %v1016_v25, %v677_v52  ;;  %v703_v42 = vmul.f32 %v1018_v53, %v681_v5  ;;  %v704_v43 = vmul.f32 %v1020_v54, %v685_v6  ;;  %v705_v48 = vmul.f32 %v1022_v55, %v689_v7 }
 0x3c0   :  { %708 = vperm.xlu0 %990, %v698_v40  }
 0x3c4   :  { %713 = vperm.xlu0 %990, %v699_v44  }
 0x3c8   :  { %718 = vperm.xlu0 %990, %v700_v47  }
 0x3cc   :  { %723 = vperm.xlu0 %990, %v701_v50  }
 0x3d0   :  { %728 = vperm.xlu0 %990, %v702_v36  }
 0x3d4   :  { %733 = vperm.xlu0 %990, %v703_v42  }
 0x3d8   :  { %738 = vperm.xlu0 %990, %v704_v43  }
 0x3dc   :  { %743 = vperm.xlu0 %990, %v705_v48  }
 0x43f   :  { %v709_v51 = vpop.permute.xlu0 %708 }
 0x440   :  { %v746_v56 = vmul.f32 %v709_v51, %v1281_v16  ;;  %v830_v8 = vrot.slane %v709_v51, %v1341_v45 }
 0x442   :  { %v754_v33 = vsel %vm100_vm1, %v746_v56, 0.0 }
 0x443   :  { %v714_v12 = vpop.permute.xlu0 %713  ;;  %v755_v58 = vrot.slane %v754_v33, 4 }
 0x444   :  { %v747_v25 = vmul.f32 %v714_v12, %v1298_v21  ;;  %v834_v4 = vrot.slane %v714_v12, %v1341_v45 }
 0x446   :  { %v761_v57 = vsel %vm100_vm1, %v747_v25, 0.0  ;;  %v859_v31 = vsel %vm494_vm2, %v834_v4, %v830_v8 }
 0x447   :  { %v719_v29 = vpop.permute.xlu0 %718  ;;  %v762_v55 = vrot.slane %v761_v57, 4 }
 0x448   :  { %v748_v53 = vmul.f32 %v719_v29, %v1277_v14  ;;  %v756_v14 = vadd.f32 %v755_v58, %v754_v33  ;;  %v838_v10 = vrot.slane %v719_v29, %v1341_v45 }
 0x449   :  { %v763_v62 = vadd.f32 %v762_v55, %v761_v57 }
 0x44a   :  { %v768_v54 = vsel %vm100_vm1, %v748_v53, 0.0  ;;  %v757_v13 = vrot.slane %v756_v14, 2  ;;  %v860_v37 = vsel %vm496_vm3, %v838_v10, %v859_v31 }
 0x44b   :  { %v724_v27 = vpop.permute.xlu0 %723  ;;  %v769_v59 = vrot.slane %v768_v54, 4  ;;  %v764_v9 = vrot.slane %v763_v62, 2 }
 0x44c   :  { %v749_v38 = vmul.f32 %v724_v27, %v1283_v17  ;;  %v842_v15 = vrot.slane %v724_v27, %v1341_v45  ;;  %v758_v41 = vadd.f32 %v757_v13, %v756_v14 }
 0x44d   :  { %v770_v63 = vadd.f32 %v769_v59, %v768_v54  ;;  %v765_v35 = vadd.f32 %v764_v9, %v763_v62 }
 0x44e   :  { %v775_v60 = vsel %vm100_vm1, %v749_v38, 0.0  ;;  %v861_v46 = vsel %vm498_vm4, %v842_v15, %v860_v37  ;;  %v759_v53 = vrot.slane %v758_v41, 1 }
 0x44f   :  { %v776_v21 = vrot.slane %v775_v60, 4  ;;  %v729_v61 = vpop.permute.xlu0 %728  ;;  %v766_v7 = vrot.slane %v765_v35, 1 }
 0x450   :  { %v750_v16 = vmul.f32 %v729_v61, %v1286_v18  ;;  %v771_v18 = vrot.slane %v770_v63, 2  ;;  %v846_v26 = vrot.slane %v729_v61, %v1341_v45 }
 0x451   :  { %v777_v1 = vadd.f32 %v776_v21, %v775_v60 }
 0x452   :  { %v782_v0 = vsel %vm100_vm1, %v750_v16, 0.0  ;;  %v772_v44 = vadd.f32 %v771_v18, %v770_v63  ;;  %v862_v50 = vsel %vm500_vm5, %v846_v26, %v861_v46 }
 0x453   :  { %v783_v2 = vrot.slane %v782_v0, 4  ;;  %v734_v3 = vpop.permute.xlu0 %733  ;;  %v778_v24 = vrot.slane %v777_v1, 2 }
 0x454   :  { %v751_v17 = vmul.f32 %v734_v3, %v1294_v19  ;;  %v850_v32 = vrot.slane %v734_v3, %v1341_v45  ;;  %v773_v25 = vrot.slane %v772_v44, 1 }
 0x455   :  { %v784_v11 = vadd.f32 %v783_v2, %v782_v0  ;;  %v779_v49 = vadd.f32 %v778_v24, %v777_v1 }
 0x456   :  { %v789_v23 = vsel %vm100_vm1, %v751_v17, 0.0  ;;  %v863_v42 = vsel %vm502_vm6, %v850_v32, %v862_v50 }
 0x457   :  { %v790_v28 = vrot.slane %v789_v23, 4  ;;  %v739_v30 = vpop.permute.xlu0 %738  ;;  %v785_v19 = vrot.slane %v784_v11, 2  ;;  %v780_v57 = vrot.slane %v779_v49, 1 }
 0x458   :  { %v752_v34 = vmul.f32 %v739_v30, %v1296_v20  ;;  %v854_v40 = vrot.slane %v739_v30, %v1341_v45 }
 0x459   :  { %v791_v39 = vadd.f32 %v790_v28, %v789_v23  ;;  %v786_v5 = vadd.f32 %v785_v19, %v784_v11 }
 0x45a   :  { %v796_v47 = vsel %vm100_vm1, %v752_v34, 0.0  ;;  %v864_v12 = vsel %vm504_vm7, %v854_v40, %v863_v42 }
 0x45b   :  { %v792_v52 = vrot.slane %v791_v39, 2  ;;  %v797_v36 = vrot.slane %v796_v47, 4  ;;  %v744_v20 = vpop.permute.xlu0 %743 }
 0x45c   :  { %v753_v6 = vmul.f32 %v744_v20, %v1304_v22  ;;  %v858_v43 = vrot.slane %v744_v20, %v1341_v45  ;;  %v787_v22 = vrot.slane %v786_v5, 1 }
 0x45d   :  { %v793_v48 = vadd.f32 %v792_v52, %v791_v39  ;;  %v798_v51 = vadd.f32 %v797_v36, %v796_v47 }
 0x45e   :  { %v803_v56 = vsel %vm100_vm1, %v753_v6, 0.0  ;;  %v865_v29 = vsel %vm506_vm8, %v858_v43, %v864_v12 }
 0x45f   :  { %v799_v33 = vrot.slane %v798_v51, 2  ;;  %v804_v54 = vrot.slane %v803_v56, 4  ;;  %867 = vst.msk [vmem:[#allocation11] sm:$0xff] %vm509_vm9, %v865_v29 }
 0x460   :  { %1124 = shalt.err (!%p1121_p8)
}
 0x461   :  { %s1125_s30 = scalar_lea.hbm %s1483_s7, 128 }
 0x462   :  { %p1126_p9 = scmp.ne.s32.totalorder %s1483_s7, %s1125_s30  ;;  %p1129_p10 = scmp.lt.u32.totalorder %s1125_s30, %s1483_s7 }
 0x464   :  { %p1131_p11 = pnand %p1129_p10, %p1126_p9 }
 0x466   :  { %1134 = shalt.err (!%p1131_p11)
}
 0x467   :  { %887 = dma.vmem_to_hbm [thread:$0]  %s885_s25, 128, %s1483_s7, [#allocation12]   ;;  %v767_v45 = vadd.f32 %v766_v7, %v765_v35  ;;  %v794_v27 = vrot.slane %v793_v48, 1  ;;  %v800_v38 = vadd.f32 %v799_v33, %v798_v51  ;;  %v805_v55 = vadd.f32 %v804_v54, %v803_v56 }
 0x468   :  { %v774_v58 = vadd.f32 %v773_v25, %v772_v44  ;;  %v760_v59 = vadd.f32 %v759_v53, %v758_v41  ;;  %v781_v60 = vadd.f32 %v780_v57, %v779_v49  ;;  %v788_v16 = vadd.f32 %v787_v22, %v786_v5  ;;  %s1179_s7 = smov [#allocation10]  }
 0x469   :  { %v801_v21 = vrot.slane %v800_v38, 1  ;;  %v806_v61 = vrot.slane %v805_v55, 2  ;;  %v795_v14 = vadd.f32 %v794_v27, %v793_v48  ;;  %s874_s15 = sshll.u32 %s1179_s7, 4  ;;  %s875_s15 = int_to_ptr.vmem [resolvable:$true] %s874_s15 }
 0x46a   :  { %v818_v62 = vsel %vm494_vm2, %v767_v45, %v760_v59  ;;  %s1135_s16 = scalar_lea.vmem %s875_s15, 128  ;;  %p1140_p13 = scmp.lt.s32.totalorder %s875_s15, %s875_s15 }
 0x46b   :  { %v807_v63 = vadd.f32 %v806_v61, %v805_v55  ;;  %v819_v0 = vsel %vm496_vm3, %v774_v58, %v818_v62  ;;  %v802_v1 = vadd.f32 %v801_v21, %v800_v38  ;;  %p1136_p12 = scmp.ne.s32.totalorder %s875_s15, %s1135_s16  ;;  %p1141_p0 = scmp.lt.s32.totalorder %s1135_s16, %s1135_s16 }
 0x46c   :  { %v820_v3 = vsel %vm498_vm4, %v781_v60, %v819_v0 }
 0x46d   :  { %v808_v2 = vrot.slane %v807_v63, 1  ;;  %v821_v4 = vsel %vm500_vm5, %v788_v16, %v820_v3  ;;  %p1142_p1 = por %p1141_p0, %p1140_p13 }
 0x46e   :  { %v822_v8 = vsel %vm502_vm6, %v795_v14, %v821_v4 }
 0x46f   :  { %v809_v17 = vadd.f32 %v808_v2, %v807_v63  ;;  %v823_v9 = vsel %vm504_vm7, %v802_v1, %v822_v8  ;;  %p1143_p2 = pnand %p1142_p1, %p1136_p12 }
 0x471   :  { %v824_v10 = vsel %vm506_vm8, %v809_v17, %v823_v9 }
 0x472   :  { %826 = vst.msk [vmem:[#allocation10] sm:$0xff] %vm100_vm1, %v824_v10 }
 0x473   :  { %1146 = shalt.err (!%p1143_p2)
}
 0x474   :  { %s1147_s20 = scalar_lea.hbm %s1482_s6, 128 }
 0x475   :  { %p1148_p3 = scmp.ne.s32.totalorder %s1482_s6, %s1147_s20  ;;  %p1151_p4 = scmp.lt.u32.totalorder %s1147_s20, %s1482_s6 }
 0x477   :  { %p1153_p5 = pnand %p1151_p4, %p1148_p3 }
 0x479   :  { %1156 = shalt.err (!%p1153_p5)
}
 0x47a   :  { %877 = dma.vmem_to_hbm [thread:$0]  %s875_s15, 128, %s1482_s6, [#allocation4]  }
 0x47b   :  { %1163 = dma.done.wait [#allocation4], 128  }
 0x47c   :  { %1164 = vsyncadd [#allocation4], 4294967168 }
 0x47d   :  { %1165 = dma.done.wait [#allocation12], 128  }
 0x47e   :  { %1166 = vsyncadd [#allocation12], 4294967168 }
 0x47f   :  { %894 = vsyncpa [#allocation3], 1 }
 0x480   :  { %895 = vsyncpa [#allocation6], 1 }
 0x481   :  { %896 = vsyncpa [#allocation9], 1 }
 0x482   :  { %897 = vsyncpa [#allocation4], 1 }
 0x483   :  { %898 = vsyncpa [#allocation12], 1 }

</bundles_post_ra>
